<compile_context>
chip_gen: v7x
topology: tpu7x:2x2x1
jax: 0.10.0
libtpu: 0.0.40
codegen_flags: <defaults>
</compile_context>

<pallas_src>
import jax
import jax.numpy as jnp
from jax import lax
from jax.experimental import pallas as pl
from jax.experimental.pallas import tpu as pltpu


def _critic_kernel(x_ref, w1_ref, b1_ref, w2_ref, b2_ref, w3_ref, b3_ref, oT_ref):
    # x_ref: [TB, D_in] tile of the batch in its natural layout.
    x = x_ref[...]
    # fc1: contract d_in of W1 [256, D_in] with d_in of x [TB, D_in] -> [256, TB]
    # (transpose folded into the matmul; MXU, f32 accumulate)
    h1 = lax.dot_general(
        w1_ref[...], x,
        dimension_numbers=(((1,), (1,)), ((), ())),
        preferred_element_type=jnp.float32,
    ) + b1_ref[...]
    h1 = jnp.maximum(h1, 0.0)
    # fc2: [128, 256] @ [256, TB] -> [128, TB]
    h2 = jnp.dot(w2_ref[...], h1, preferred_element_type=jnp.float32) + b2_ref[...]
    h2 = jnp.maximum(h2, 0.0)
    # fc3: [1, 128] @ [128, TB] -> [1, TB]  (lane-dense output store)
    o = jnp.dot(w3_ref[...], h2, preferred_element_type=jnp.float32)
    oT_ref[...] = o + b3_ref[0, 0]  # scalar bias from SMEM


def critic_forward(x, params, *, tb=2048):
    """x: [B, input_size] float32 -> [B, 1] float32."""
    w1, b1, w2, b2, w3, b3 = params
    B, d_in = x.shape
    h1_dim = w1.shape[0]  # 256
    h2_dim = w2.shape[0]  # 128

    x = x.astype(jnp.float32)

    # Batch tile: multiple of 128 lanes, capped at `tb`, clamped to the batch.
    tb = max(128, (tb // 128) * 128)
    b_up128 = ((B + 127) // 128) * 128
    tb_eff = min(tb, b_up128)
    # v7x dual-TC sharding: make sure the parallel batch axis has >= 2 steps
    # for mid/large batches so both TensorCores get work.
    if B > 256 and pl.cdiv(B, tb_eff) < 2:
        tb_eff = max(128, ((b_up128 // 2) // 128) * 128)

    grid = (pl.cdiv(B, tb_eff),)

    flops = 2 * B * (d_in * h1_dim + h1_dim * h2_dim + h2_dim)
    bytes_accessed = 4 * (x.size + B + w1.size + b1.size + w2.size + b2.size
                          + w3.size + b3.size)

    # TODO(synk): optionally stream x / weights in bf16 (f32 MXU accumulate) to
    # halve HBM traffic; kept f32 here to match the f32 reference bit-for-bit.
    oT = pl.pallas_call(
        _critic_kernel,
        out_shape=jax.ShapeDtypeStruct((1, B), jnp.float32),
        grid=grid,
        in_specs=[
            # streaming batch tile, natural [tb, d_in] layout
            pl.BlockSpec((tb_eff, d_in), lambda i: (i, 0)),
            # weights/biases: constant index_map -> DMA'd once, VMEM-resident
            pl.BlockSpec((h1_dim, d_in), lambda i: (0, 0)),
            pl.BlockSpec((h1_dim, 1), lambda i: (0, 0)),
            pl.BlockSpec((h2_dim, h1_dim), lambda i: (0, 0)),
            pl.BlockSpec((h2_dim, 1), lambda i: (0, 0)),
            pl.BlockSpec((1, h2_dim), lambda i: (0, 0)),
            # fc3 bias: single scalar, keep it in SMEM
            pl.BlockSpec(memory_space=pltpu.MemorySpace.SMEM),
        ],
        out_specs=pl.BlockSpec((1, tb_eff), lambda i: (0, i)),
        compiler_params=pltpu.CompilerParams(
            dimension_semantics=("parallel",)),
        cost_estimate=pl.CostEstimate(
            flops=flops, transcendentals=0, bytes_accessed=bytes_accessed),
    )(x, w1, b1, w2, b2, w3, b3)

    return oT.T  # [B, 1]


def init_params(key, input_size, fc1_output_dim=256, fc2_output_dim=128):
    """Deterministic init mimicking PyTorch nn.Linear (uniform +/- 1/sqrt(fan_in)).
    Weights stored in PyTorch layout [out, in]; biases as [out, 1]."""
    def linear(k, fan_in, fan_out):
        kw, kb = jax.random.split(k)
        bound = 1.0 / jnp.sqrt(jnp.float32(fan_in))
        w = jax.random.uniform(kw, (fan_out, fan_in), jnp.float32, -bound, bound)
        b = jax.random.uniform(kb, (fan_out, 1), jnp.float32, -bound, bound)
        return w, b

    k1, k2, k3 = jax.random.split(key, 3)
    w1, b1 = linear(k1, input_size, fc1_output_dim)
    w2, b2 = linear(k2, fc1_output_dim, fc2_output_dim)
    w3, b3 = linear(k3, fc2_output_dim, 1)
    return (w1, b1, w2, b2, w3, b3)


def _reference(x, params):
    w1, b1, w2, b2, w3, b3 = params
    h1 = jnp.maximum(x @ w1.T + b1.T, 0.0)
    h2 = jnp.maximum(h1 @ w2.T + b2.T, 0.0)
    return h2 @ w3.T + b3.T


# TODO(synk): optimizer (Adam) and checkpoint save/load from the PyTorch module
# are training/IO utilities, not part of the forward pass; not implemented here.

if __name__ == "__main__":
    key = jax.random.PRNGKey(0)
    k_x, k_p = jax.random.split(key)

    batch = 8
    input_size = 32

    x = jax.random.normal(k_x, (batch, input_size), dtype=jnp.float32)
    params = init_params(k_p, input_size)

    out = jax.block_until_ready(critic_forward(x, params))
    ref = _reference(x, params)
    assert out.shape == (batch, 1), out.shape
    assert jnp.allclose(out, ref, atol=1e-4, rtol=1e-4), (
        f"max abs err {jnp.max(jnp.abs(out - ref))}")

    # Larger, non-multiple-of-tile batch: exercises multiple grid steps
    # (v7x >=2-step rule with the default tile) and the clamped partial
    # last block on both the input and the output.
    xb = jax.random.normal(k_x, (1000, input_size), dtype=jnp.float32)
    outb = jax.block_until_ready(critic_forward(xb, params))
    refb = _reference(xb, params)
    assert outb.shape == (1000, 1), outb.shape
    assert jnp.allclose(outb, refb, atol=1e-4, rtol=1e-4), (
        f"max abs err {jnp.max(jnp.abs(outb - refb))}")

    # Explicit small tile: 4 grid steps at tb=256, same numerics.
    outc = jax.block_until_ready(critic_forward(xb, params, tb=256))
    assert jnp.allclose(outc, refb, atol=1e-4, rtol=1e-4), (
        f"max abs err {jnp.max(jnp.abs(outc - refb))}")

    print("KERNEL_OK")
</pallas_src>

<mosaic_0001>
module attributes {stable_mosaic.version = 11 : i64} {
  func.func @_critic_kernel(%arg0: i32, %arg1: memref<128x32xf32, #tpu.memory_space<vmem>>, %arg2: memref<256x32xf32, #tpu.memory_space<vmem>>, %arg3: memref<256x1xf32, #tpu.memory_space<vmem>>, %arg4: memref<128x256xf32, #tpu.memory_space<vmem>>, %arg5: memref<128x1xf32, #tpu.memory_space<vmem>>, %arg6: memref<1x128xf32, #tpu.memory_space<vmem>>, %arg7: memref<1x1xf32, #tpu.memory_space<smem>>, %arg8: memref<1x128xf32, #tpu.memory_space<vmem>>) attributes {dimension_semantics = [#tpu.dimension_semantics<parallel>], iteration_bounds = array<i64: 1>, scalar_prefetch = 0 : i64, scratch_operands = 0 : i64, tpu.core_type = #tpu.core_type<tc>, window_params = [{transform_indices = @transform_0, window_bounds = array<i64: 128, 32>}, {pipeline_mode = #tpu.pipeline_mode<synchronous>, transform_indices = @transform_1, window_bounds = array<i64: 256, 32>}, {pipeline_mode = #tpu.pipeline_mode<synchronous>, transform_indices = @transform_2, window_bounds = array<i64: 256, 1>}, {pipeline_mode = #tpu.pipeline_mode<synchronous>, transform_indices = @transform_3, window_bounds = array<i64: 128, 256>}, {pipeline_mode = #tpu.pipeline_mode<synchronous>, transform_indices = @transform_4, window_bounds = array<i64: 128, 1>}, {pipeline_mode = #tpu.pipeline_mode<synchronous>, transform_indices = @transform_5, window_bounds = array<i64: 1, 128>}, {transform_indices = @transform_6, window_bounds = array<i64: 1, 1>}, {transform_indices = @transform_7, window_bounds = array<i64: 1, 128>}]} {
    %c0 = arith.constant 0 : index
    %c0_0 = arith.constant 0 : index
    %0 = vector.load %arg1[%c0, %c0_0] : memref<128x32xf32, #tpu.memory_space<vmem>>, vector<128x32xf32>
    %c0_1 = arith.constant 0 : index
    %c0_2 = arith.constant 0 : index
    %1 = vector.load %arg2[%c0_1, %c0_2] : memref<256x32xf32, #tpu.memory_space<vmem>>, vector<256x32xf32>
    %cst = arith.constant dense<0.000000e+00> : vector<256x128xf32>
    %2 = tpu.matmul %1, %0, %cst {dimension_numbers = #tpu.dot_dimension_numbers<[1], [1], [0], [0], [0, 0, 1, 0], [], []>} : vector<256x32xf32>, vector<128x32xf32>, vector<256x128xf32> -> vector<256x128xf32>
    %c0_3 = arith.constant 0 : index
    %c0_4 = arith.constant 0 : index
    %3 = vector.load %arg3[%c0_3, %c0_4] : memref<256x1xf32, #tpu.memory_space<vmem>>, vector<256x1xf32>
    %4 = vector.broadcast %3 : vector<256x1xf32> to vector<256x128xf32>
    %5 = arith.addf %2, %4 : vector<256x128xf32>
    %cst_5 = arith.constant 0.000000e+00 : f32
    %6 = vector.broadcast %cst_5 : f32 to vector<256x128xf32>
    %7 = arith.maximumf %5, %6 : vector<256x128xf32>
    %c0_6 = arith.constant 0 : index
    %c0_7 = arith.constant 0 : index
    %8 = vector.load %arg4[%c0_6, %c0_7] : memref<128x256xf32, #tpu.memory_space<vmem>>, vector<128x256xf32>
    %cst_8 = arith.constant dense<0.000000e+00> : vector<128x128xf32>
    %9 = tpu.matmul %8, %7, %cst_8 {dimension_numbers = #tpu.dot_dimension_numbers<[1], [0], [0], [1], [0, 0, 1, 1], [], []>} : vector<128x256xf32>, vector<256x128xf32>, vector<128x128xf32> -> vector<128x128xf32>
    %c0_9 = arith.constant 0 : index
    %c0_10 = arith.constant 0 : index
    %10 = vector.load %arg5[%c0_9, %c0_10] : memref<128x1xf32, #tpu.memory_space<vmem>>, vector<128x1xf32>
    %11 = vector.broadcast %10 : vector<128x1xf32> to vector<128x128xf32>
    %12 = arith.addf %9, %11 : vector<128x128xf32>
    %cst_11 = arith.constant 0.000000e+00 : f32
    %13 = vector.broadcast %cst_11 : f32 to vector<128x128xf32>
    %14 = arith.maximumf %12, %13 : vector<128x128xf32>
    %c0_12 = arith.constant 0 : index
    %c0_13 = arith.constant 0 : index
    %15 = vector.load %arg6[%c0_12, %c0_13] : memref<1x128xf32, #tpu.memory_space<vmem>>, vector<1x128xf32>
    %cst_14 = arith.constant dense<0.000000e+00> : vector<1x128xf32>
    %16 = tpu.matmul %15, %14, %cst_14 {dimension_numbers = #tpu.dot_dimension_numbers<[1], [0], [0], [1], [0, 0, 1, 1], [], []>} : vector<1x128xf32>, vector<128x128xf32>, vector<1x128xf32> -> vector<1x128xf32>
    %c0_15 = arith.constant 0 : index
    %c0_16 = arith.constant 0 : index
    %17 = memref.load %arg7[%c0_15, %c0_16] : memref<1x1xf32, #tpu.memory_space<smem>>
    %18 = vector.broadcast %17 : f32 to vector<1x128xf32>
    %19 = arith.addf %16, %18 : vector<1x128xf32>
    %c0_17 = arith.constant 0 : index
    %c0_18 = arith.constant 0 : index
    %20 = vector.load %arg8[%c0_17, %c0_18] : memref<1x128xf32, #tpu.memory_space<vmem>>, vector<1x128xf32>
    tpu.vector_store %arg8[%c0_17, %c0_18], %19 {strides = array<i32>} : memref<1x128xf32, #tpu.memory_space<vmem>>, vector<1x128xf32>,
    return
  }
  func.func @transform_0(%arg0: i32) -> (i32, i32) {
    %c0_i32 = arith.constant 0 : i32
    %c0_i32_0 = arith.constant 0 : i32
    return %arg0, %c0_i32 : i32, i32
  }
  func.func @transform_1(%arg0: i32) -> (i32, i32) {
    %c0_i32 = arith.constant 0 : i32
    %c0_i32_0 = arith.constant 0 : i32
    %c0_i32_1 = arith.constant 0 : i32
    return %c0_i32, %c0_i32_0 : i32, i32
  }
  func.func @transform_2(%arg0: i32) -> (i32, i32) {
    %c0_i32 = arith.constant 0 : i32
    %c0_i32_0 = arith.constant 0 : i32
    %c0_i32_1 = arith.constant 0 : i32
    return %c0_i32, %c0_i32_0 : i32, i32
  }
  func.func @transform_3(%arg0: i32) -> (i32, i32) {
    %c0_i32 = arith.constant 0 : i32
    %c0_i32_0 = arith.constant 0 : i32
    %c0_i32_1 = arith.constant 0 : i32
    return %c0_i32, %c0_i32_0 : i32, i32
  }
  func.func @transform_4(%arg0: i32) -> (i32, i32) {
    %c0_i32 = arith.constant 0 : i32
    %c0_i32_0 = arith.constant 0 : i32
    %c0_i32_1 = arith.constant 0 : i32
    return %c0_i32, %c0_i32_0 : i32, i32
  }
  func.func @transform_5(%arg0: i32) -> (i32, i32) {
    %c0_i32 = arith.constant 0 : i32
    %c0_i32_0 = arith.constant 0 : i32
    %c0_i32_1 = arith.constant 0 : i32
    return %c0_i32, %c0_i32_0 : i32, i32
  }
  func.func @transform_6(%arg0: i32) -> (i32, i32) {
    %c0_i32 = arith.constant 0 : i32
    %c0_i32_0 = arith.constant 0 : i32
    %c0_i32_1 = arith.constant 0 : i32
    return %c0_i32, %c0_i32_0 : i32, i32
  }
  func.func @transform_7(%arg0: i32) -> (i32, i32) {
    %c0_i32 = arith.constant 0 : i32
    %c0_i32_0 = arith.constant 0 : i32
    return %c0_i32, %arg0 : i32, i32
  }
}

</mosaic_0001>

<bundles_post_ra>
// kernel: tpu_custom_call.1
= control target key start
LH: loop header
LB: loop body
LE: loop exit
PB: predicated region body
PF: predicated region fallthrough
CT: control target
= control target key end

     0   :  { %vm268_vm0 = vcmask 261120   ;;  %v1490_v6 = vmov 0   ;;  %s2087_s0 = inlined_call_operand.vmem [shape: f32[8,32], index: 0, kind: input, shape index: {}]   ;;  %s2088_s1 = inlined_call_operand.vmem [shape: f32[256,32], index: 1, kind: input, shape index: {}]   ;;  %s2089_s2 = inlined_call_operand.vmem [shape: f32[256,1], index: 2, kind: input, shape index: {}]   ;;  %s2090_s3 = inlined_call_operand.vmem [shape: f32[128,256], index: 3, kind: input, shape index: {}]   ;;  %s2091_s4 = inlined_call_operand.vmem [shape: f32[128,1], index: 4, kind: input, shape index: {}]   ;;  %s2092_s5 = inlined_call_operand.vmem [shape: f32[1,128], index: 5, kind: input, shape index: {}]   ;;  %s2093_s6 = inlined_call_operand.<no memory space> [shape: f32[1,1], index: 6, kind: input, shape index: {}]   ;;  %s2094_s7 = inlined_call_operand.hbm [shape: f32[1,8], index: 7, kind: output, shape index: {}]  }
   0x1   :  { %v28_v0 = vld [vmem:[%s2087_s0] sm:$0xff]  ;;  %v29_v1 = vld [vmem:[%s2087_s0 + $0x8] sm:$0xff]  ;;  %v30_v2 = vld [vmem:[%s2087_s0 + $0x10] sm:$0xff]  ;;  %1465 = vset.pattern.permute.xlu1 %v1490_v6  ;;  %1464 = vset.pattern.permute.xlu0 %v1490_v6 }
   0x2   :  { %v1355_v3 = vpack.c.bf16 %v29_v1, %v28_v0  ;;  %vm1546_vm1 = vmpackc.low %vm268_vm0, %vm268_vm0  ;;  %v31_v5 = vld [vmem:[%s2087_s0 + $0x18] sm:$0xff]  ;;  %v92_v8 = vld [vmem:[%s2089_s2 + $0x80] sm:$0xff] }
   0x3   :  { %v1361_v7 = vpack.c.bf16 %v31_v5, %v30_v2  ;;  %v32_v9 = vld [vmem:[%s2087_s0 + $0x20] sm:$0xff]  ;;  %v33_v10 = vld [vmem:[%s2087_s0 + $0x28] sm:$0xff]  ;;  %190 = vperm.xlu0 %1464, %v92_v8   ;;  %v94_v16 = vld [vmem:[%s2089_s2 + $0x90] sm:$0xff] }
   0x4   :  { %1357 = vmatprep.subr.msk.bf16.mxu0 %vm1546_vm1, %v1355_v3  ;;  %v76_v11 = vld [vmem:[%s2089_s2] sm:$0xff]  ;;  %v93_v12 = vld [vmem:[%s2089_s2 + $0x88] sm:$0xff]  ;;  %v1367_v15 = vpack.c.bf16 %v33_v10, %v32_v9  ;;  %v95_v17 = vld [vmem:[%s2089_s2 + $0x98] sm:$0xff] }
   0x5   :  { %1360 = vmatpush3.bf16.xpose.msk.msra.mxu0 %vm1546_vm1, %v1355_v3  ;;  %110 = vperm.xlu1 %1465, %v76_v11   ;;  %v44_v13 = vld [vmem:[%s2088_s1] sm:$0xff]  ;;  %v77_v14 = vld [vmem:[%s2089_s2 + $0x8] sm:$0xff]  ;;  %v34_v18 = vld [vmem:[%s2087_s0 + $0x30] sm:$0xff] }
   0x6   :  { %1363 = vmatprep.subr.msk.bf16.mxu0 %vm1546_vm1, %v1361_v7  ;;  %1272 = vmatprep.mubr.msk.f32.mxu0 %vm268_vm0, %v44_v13  ;;  %v35_v19 = vld [vmem:[%s2087_s0 + $0x38] sm:$0xff]  ;;  %v78_v20 = vld [vmem:[%s2089_s2 + $0x10] sm:$0xff]  ;;  %v96_v23 = vld [vmem:[%s2089_s2 + $0xa0] sm:$0xff] }
   0x7   :  { %195 = vperm.xlu0 %1464, %v93_v12   ;;  %v79_v21 = vld [vmem:[%s2089_s2 + $0x18] sm:$0xff]  ;;  %v1373_v22 = vpack.c.bf16 %v35_v19, %v34_v18  ;;  %v97_v24 = vld [vmem:[%s2089_s2 + $0xa8] sm:$0xff]  ;;  %v36_v25 = vld [vmem:[%s2087_s0 + $0x40] sm:$0xff] }
   0x8   :  { %v37_v26 = vld [vmem:[%s2087_s0 + $0x48] sm:$0xff]  ;;  %v80_v27 = vld [vmem:[%s2089_s2 + $0x20] sm:$0xff]  ;;  %v98_v30 = vld [vmem:[%s2089_s2 + $0xb0] sm:$0xff] }
   0x9   :  { %115 = vperm.xlu1 %1465, %v77_v14   ;;  %v81_v28 = vld [vmem:[%s2089_s2 + $0x28] sm:$0xff]  ;;  %v1379_v29 = vpack.c.bf16 %v37_v26, %v36_v25  ;;  %v99_v31 = vld [vmem:[%s2089_s2 + $0xb8] sm:$0xff]  ;;  %v38_v32 = vld [vmem:[%s2087_s0 + $0x50] sm:$0xff] }
   0xa   :  { %v39_v33 = vld [vmem:[%s2087_s0 + $0x58] sm:$0xff]  ;;  %v82_v34 = vld [vmem:[%s2089_s2 + $0x30] sm:$0xff] }
   0xb   :  { %200 = vperm.xlu0 %1464, %v94_v16   ;;  %v83_v35 = vld [vmem:[%s2089_s2 + $0x38] sm:$0xff] }
   0xd   :  { %1366 = vmatpush3.bf16.xpose.msk.msra.mxu0 %vm1546_vm1, %v1361_v7  ;;  %205 = vperm.xlu1 %1465, %v95_v17  }
   0xe   :  { %1369 = vmatprep.subr.msk.bf16.mxu0 %vm1546_vm1, %v1367_v15 }
   0xf   :  { %120 = vperm.xlu0 %1464, %v78_v20  }
  0x11   :  { %125 = vperm.xlu1 %1465, %v79_v21  }
  0x13   :  { %210 = vperm.xlu0 %1464, %v96_v23  }
  0x15   :  { %1372 = vmatpush3.bf16.xpose.msk.msra.mxu0 %vm1546_vm1, %v1367_v15  ;;  %215 = vperm.xlu1 %1465, %v97_v24  }
  0x16   :  { %1375 = vmatprep.subr.msk.bf16.mxu0 %vm1546_vm1, %v1373_v22 }
  0x17   :  { %130 = vperm.xlu0 %1464, %v80_v27  }
  0x19   :  { %135 = vperm.xlu1 %1465, %v81_v28  }
  0x1b   :  { %220 = vperm.xlu0 %1464, %v98_v30  }
  0x1d   :  { %1378 = vmatpush3.bf16.xpose.msk.msra.mxu0 %vm1546_vm1, %v1373_v22  ;;  %225 = vperm.xlu1 %1465, %v99_v31  }
  0x1e   :  { %1381 = vmatprep.subr.msk.bf16.mxu0 %vm1546_vm1, %v1379_v29 }
  0x1f   :  { %13 = vsyncpa [#allocation4], 0  ;;  %v1385_v36 = vpack.c.bf16 %v39_v33, %v38_v32  ;;  %140 = vperm.xlu0 %1464, %v82_v34   ;;  %v100_v37 = vld [vmem:[%s2089_s2 + $0xc0] sm:$0xff]  ;;  %v101_v38 = vld [vmem:[%s2089_s2 + $0xc8] sm:$0xff]  ;;  %vm1492_vm2 = vmmov 0   ;;  %s1494_s10 = smov [#allocation3]  }
  0x20   :  { %v40_v39 = vld [vmem:[%s2087_s0 + $0x60] sm:$0xff]  ;;  %v41_v40 = vld [vmem:[%s2087_s0 + $0x68] sm:$0xff]  ;;  %v102_v44 = vld [vmem:[%s2089_s2 + $0xd0] sm:$0xff]  ;;  %s1039_s11 = sshll.u32 %s1494_s10, 4  ;;  %s1040_s11 = int_to_ptr.vmem [resolvable:$true] %s1039_s11 }
  0x21   :  { %145 = vperm.xlu1 %1465, %v83_v35   ;;  %v84_v41 = vld [vmem:[%s2089_s2 + $0x40] sm:$0xff]  ;;  %v85_v42 = vld [vmem:[%s2089_s2 + $0x48] sm:$0xff]  ;;  %v1391_v43 = vpack.c.bf16 %v41_v40, %v40_v39  ;;  %v103_v45 = vld [vmem:[%s2089_s2 + $0xd8] sm:$0xff]  ;;  %s1466_s12 = scalar_lea.vmem %s1040_s11, 16  ;;  %s1470_s13 = scalar_lea.vmem %s1040_s11, 32 }
  0x22   :  { %v42_v46 = vld [vmem:[%s2087_s0 + $0x70] sm:$0xff]  ;;  %v43_v47 = vld [vmem:[%s2087_s0 + $0x78] sm:$0xff]  ;;  %v104_v51 = vld [vmem:[%s2089_s2 + $0xe0] sm:$0xff]  ;;  %p1467_p0 = scmp.ne.s32.totalorder %s1040_s11, %s1466_s12  ;;  %p1471_p1 = scmp.lt.s32.totalorder %s1040_s11, %s1040_s11 }
  0x23   :  { %230 = vperm.xlu0 %1464, %v100_v37   ;;  %v86_v48 = vld [vmem:[%s2089_s2 + $0x50] sm:$0xff]  ;;  %v87_v49 = vld [vmem:[%s2089_s2 + $0x58] sm:$0xff]  ;;  %v1397_v50 = vpack.c.bf16 %v43_v47, %v42_v46  ;;  %v105_v52 = vld [vmem:[%s2089_s2 + $0xe8] sm:$0xff]  ;;  %p1472_p2 = scmp.lt.s32.totalorder %s1470_s13, %s1466_s12 }
  0x24   :  { %v88_v53 = vld [vmem:[%s2089_s2 + $0x60] sm:$0xff]  ;;  %v89_v54 = vld [vmem:[%s2089_s2 + $0x68] sm:$0xff]  ;;  %v106_v55 = vld [vmem:[%s2089_s2 + $0xf0] sm:$0xff] }
  0x25   :  { %1384 = vmatpush3.bf16.xpose.msk.msra.mxu0 %vm1546_vm1, %v1379_v29  ;;  %235 = vperm.xlu1 %1465, %v101_v38   ;;  %v107_v56 = vld [vmem:[%s2089_s2 + $0xf8] sm:$0xff]  ;;  %v90_v57 = vld [vmem:[%s2089_s2 + $0x70] sm:$0xff]  ;;  %v45_v58 = vld [vmem:[%s2088_s1 + $0x8] sm:$0xff]  ;;  %p1473_p3 = por %p1472_p2, %p1471_p1 }
  0x26   :  { %1387 = vmatprep.subr.msk.bf16.mxu0 %vm1546_vm1, %v1385_v36  ;;  %v91_v59 = vld [vmem:[%s2089_s2 + $0x78] sm:$0xff]  ;;  %v46_v60 = vld [vmem:[%s2088_s1 + $0x10] sm:$0xff]  ;;  %v702_v61 = vld [vmem:[%s2091_s4] sm:$0xff] }
  0x27   :  { %150 = vperm.xlu0 %1464, %v84_v41   ;;  %v47_v62 = vld [vmem:[%s2088_s1 + $0x18] sm:$0xff]  ;;  %v703_v63 = vld [vmem:[%s2091_s4 + $0x8] sm:$0xff]  ;;  %v48_v0 = vld [vmem:[%s2088_s1 + $0x20] sm:$0xff]  ;;  %p1474_p4 = pnand %p1473_p3, %p1467_p0 }
  0x28   :  { %v704_v1 = vld [vmem:[%s2091_s4 + $0x10] sm:$0xff]  ;;  %v49_v2 = vld [vmem:[%s2088_s1 + $0x28] sm:$0xff]  ;;  %v705_v3 = vld [vmem:[%s2091_s4 + $0x18] sm:$0xff] }
  0x29   :  { %155 = vperm.xlu1 %1465, %v85_v42   ;;  %v50_v4 = vld [vmem:[%s2088_s1 + $0x30] sm:$0xff]  ;;  %v706_v5 = vld [vmem:[%s2091_s4 + $0x20] sm:$0xff]  ;;  %v51_v6 = vld [vmem:[%s2088_s1 + $0x38] sm:$0xff] }
  0x2a   :  { %v707_v7 = vld [vmem:[%s2091_s4 + $0x28] sm:$0xff]  ;;  %v52_v8 = vld [vmem:[%s2088_s1 + $0x40] sm:$0xff]  ;;  %v708_v9 = vld [vmem:[%s2091_s4 + $0x30] sm:$0xff] }
  0x2b   :  { %240 = vperm.xlu0 %1464, %v102_v44   ;;  %v53_v10 = vld [vmem:[%s2088_s1 + $0x48] sm:$0xff]  ;;  %v709_v11 = vld [vmem:[%s2091_s4 + $0x38] sm:$0xff]  ;;  %v54_v12 = vld [vmem:[%s2088_s1 + $0x50] sm:$0xff] }
  0x2c   :  { %v710_v13 = vld [vmem:[%s2091_s4 + $0x40] sm:$0xff]  ;;  %v55_v14 = vld [vmem:[%s2088_s1 + $0x58] sm:$0xff]  ;;  %v711_v15 = vld [vmem:[%s2091_s4 + $0x48] sm:$0xff] }
  0x2d   :  { %1390 = vmatpush3.bf16.xpose.msk.msra.mxu0 %vm1546_vm1, %v1385_v36  ;;  %245 = vperm.xlu1 %1465, %v103_v45   ;;  %v56_v16 = vld [vmem:[%s2088_s1 + $0x60] sm:$0xff]  ;;  %v712_v17 = vld [vmem:[%s2091_s4 + $0x50] sm:$0xff]  ;;  %v57_v18 = vld [vmem:[%s2088_s1 + $0x68] sm:$0xff] }
  0x2e   :  { %1393 = vmatprep.subr.msk.bf16.mxu0 %vm1546_vm1, %v1391_v43  ;;  %v713_v19 = vld [vmem:[%s2091_s4 + $0x58] sm:$0xff]  ;;  %v58_v20 = vld [vmem:[%s2088_s1 + $0x70] sm:$0xff]  ;;  %v714_v21 = vld [vmem:[%s2091_s4 + $0x60] sm:$0xff] }
  0x2f   :  { %160 = vperm.xlu0 %1464, %v86_v48   ;;  %v59_v22 = vld [vmem:[%s2088_s1 + $0x78] sm:$0xff]  ;;  %v715_v23 = vld [vmem:[%s2091_s4 + $0x68] sm:$0xff]  ;;  %v60_v24 = vld [vmem:[%s2088_s1 + $0x80] sm:$0xff] }
  0x30   :  { %v716_v25 = vld [vmem:[%s2091_s4 + $0x70] sm:$0xff]  ;;  %v61_v26 = vld [vmem:[%s2088_s1 + $0x88] sm:$0xff]  ;;  %v717_v27 = vld [vmem:[%s2091_s4 + $0x78] sm:$0xff] }
  0x31   :  { %165 = vperm.xlu1 %1465, %v87_v49   ;;  %v62_v28 = vld [vmem:[%s2088_s1 + $0x90] sm:$0xff]  ;;  %v63_v29 = vld [vmem:[%s2088_s1 + $0x98] sm:$0xff]  ;;  %v64_v30 = vld [vmem:[%s2088_s1 + $0xa0] sm:$0xff] }
  0x32   :  { %v65_v31 = vld [vmem:[%s2088_s1 + $0xa8] sm:$0xff]  ;;  %v66_v32 = vld [vmem:[%s2088_s1 + $0xb0] sm:$0xff]  ;;  %v67_v33 = vld [vmem:[%s2088_s1 + $0xb8] sm:$0xff] }
  0x33   :  { %250 = vperm.xlu0 %1464, %v104_v51   ;;  %v68_v34 = vld [vmem:[%s2088_s1 + $0xc0] sm:$0xff]  ;;  %v69_v35 = vld [vmem:[%s2088_s1 + $0xc8] sm:$0xff]  ;;  %v70_v36 = vld [vmem:[%s2088_s1 + $0xd0] sm:$0xff] }
  0x34   :  { %v71_v37 = vld [vmem:[%s2088_s1 + $0xd8] sm:$0xff]  ;;  %v72_v38 = vld [vmem:[%s2088_s1 + $0xe0] sm:$0xff]  ;;  %v73_v39 = vld [vmem:[%s2088_s1 + $0xe8] sm:$0xff] }
  0x35   :  { %1396 = vmatpush3.bf16.xpose.msk.msra.mxu0 %vm1546_vm1, %v1391_v43  ;;  %255 = vperm.xlu1 %1465, %v105_v52   ;;  %v74_v40 = vld [vmem:[%s2088_s1 + $0xf0] sm:$0xff]  ;;  %v75_v41 = vld [vmem:[%s2088_s1 + $0xf8] sm:$0xff]  ;;  %v671_v44 = vld [vmem:[%s2090_s3 + $0x8] sm:$0xff] }
  0x36   :  { %1399 = vmatprep.subr.msk.bf16.mxu0 %vm1546_vm1, %v1397_v50  ;;  %862 = vmatprep.mubr.f32.mxu1 %v671_v44 }
  0x37   :  { %170 = vperm.xlu0 %1464, %v88_v53  }
  0x39   :  { %175 = vperm.xlu1 %1465, %v89_v54  }
  0x3b   :  { %260 = vperm.xlu0 %1464, %v106_v55  }
  0x3d   :  { %1402 = vmatpush3.bf16.xpose.msk.msra.mxu0 %vm1546_vm1, %v1397_v50  ;;  %265 = vperm.xlu1 %1465, %v107_v56  }
  0x3f   :  { %180 = vperm.xlu0 %1464, %v90_v57  }
  0x41   :  { %185 = vperm.xlu1 %1465, %v91_v59  }
  0x43   :  { %720 = vperm.xlu0 %1464, %v702_v61  }
  0x44   :  { %1273 = vmatmul.mubr.msk.f32.vlgmr.msra.gmra.mrb[0].mxu0 %vm268_vm0, %v45_v58 }
  0x45   :  { %1275 = vmatprep.mubr.msk.f32.mxu0 %vm268_vm0, %v46_v60  ;;  %725 = vperm.xlu1 %1465, %v703_v63  }
  0x47   :  { %730 = vperm.xlu0 %1464, %v704_v1  }
  0x48   :  { %1276 = vmatmul.mubr.msk.f32.gmra.mrb[2].mxu0 %vm268_vm0, %v47_v62 }
  0x49   :  { %1278 = vmatprep.mubr.msk.f32.mxu0 %vm268_vm0, %v48_v0  ;;  %735 = vperm.xlu1 %1465, %v705_v3  }
  0x4b   :  { %740 = vperm.xlu0 %1464, %v706_v5  }
  0x4c   :  { %1279 = vmatmul.mubr.msk.f32.gmra.mrb[4].mxu0 %vm268_vm0, %v49_v2 }
  0x4d   :  { %1281 = vmatprep.mubr.msk.f32.mxu0 %vm268_vm0, %v50_v4  ;;  %745 = vperm.xlu1 %1465, %v707_v7  }
  0x4f   :  { %750 = vperm.xlu0 %1464, %v708_v9  }
  0x50   :  { %1282 = vmatmul.mubr.msk.f32.gmra.mrb[6].mxu0 %vm268_vm0, %v51_v6 }
  0x51   :  { %1284 = vmatprep.mubr.msk.f32.mxu0 %vm268_vm0, %v52_v8  ;;  %755 = vperm.xlu1 %1465, %v709_v11  }
  0x53   :  { %760 = vperm.xlu0 %1464, %v710_v13  }
  0x54   :  { %1285 = vmatmul.mubr.msk.f32.gmra.mrb[8].mxu0 %vm268_vm0, %v53_v10 }
  0x55   :  { %1287 = vmatprep.mubr.msk.f32.mxu0 %vm268_vm0, %v54_v12  ;;  %765 = vperm.xlu1 %1465, %v711_v15  }
  0x57   :  { %770 = vperm.xlu0 %1464, %v712_v17  }
  0x58   :  { %1288 = vmatmul.mubr.msk.f32.gmra.mrb[10].mxu0 %vm268_vm0, %v55_v14 }
  0x59   :  { %1290 = vmatprep.mubr.msk.f32.mxu0 %vm268_vm0, %v56_v16  ;;  %775 = vperm.xlu1 %1465, %v713_v19  }
  0x5b   :  { %780 = vperm.xlu0 %1464, %v714_v21  }
  0x5c   :  { %1291 = vmatmul.mubr.msk.f32.gmra.mrb[12].mxu0 %vm268_vm0, %v57_v18 }
  0x5d   :  { %1293 = vmatprep.mubr.msk.f32.mxu0 %vm268_vm0, %v58_v20  ;;  %785 = vperm.xlu1 %1465, %v715_v23  }
  0x5f   :  { %790 = vperm.xlu0 %1464, %v716_v25  }
  0x60   :  { %1294 = vmatmul.mubr.msk.f32.gmra.mrb[14].mxu0 %vm268_vm0, %v59_v22 }
  0x61   :  { %1296 = vmatprep.mubr.msk.f32.mxu0 %vm268_vm0, %v60_v24  ;;  %795 = vperm.xlu1 %1465, %v717_v27  }
  0x64   :  { %1297 = vmatmul.mubr.msk.f32.gmra.mrb[16].mxu0 %vm268_vm0, %v61_v26 }
  0x65   :  { %1299 = vmatprep.mubr.msk.f32.mxu0 %vm268_vm0, %v62_v28 }
  0x68   :  { %1300 = vmatmul.mubr.msk.f32.gmra.mrb[18].mxu0 %vm268_vm0, %v63_v29 }
  0x69   :  { %1302 = vmatprep.mubr.msk.f32.mxu0 %vm268_vm0, %v64_v30 }
  0x6c   :  { %1303 = vmatmul.mubr.msk.f32.gmra.mrb[20].mxu0 %vm268_vm0, %v65_v31 }
  0x6d   :  { %1305 = vmatprep.mubr.msk.f32.mxu0 %vm268_vm0, %v66_v32 }
  0x70   :  { %1306 = vmatmul.mubr.msk.f32.gmra.mrb[22].mxu0 %vm268_vm0, %v67_v33 }
  0x71   :  { %1308 = vmatprep.mubr.msk.f32.mxu0 %vm268_vm0, %v68_v34 }
  0x74   :  { %1309 = vmatmul.mubr.msk.f32.gmra.mrb[24].mxu0 %vm268_vm0, %v69_v35 }
  0x75   :  { %1311 = vmatprep.mubr.msk.f32.mxu0 %vm268_vm0, %v70_v36 }
  0x78   :  { %1312 = vmatmul.mubr.msk.f32.gmra.mrb[26].mxu0 %vm268_vm0, %v71_v37 }
  0x79   :  { %1314 = vmatprep.mubr.msk.f32.mxu0 %vm268_vm0, %v72_v38 }
  0x7c   :  { %1315 = vmatmul.mubr.msk.f32.gmra.mrb[28].mxu0 %vm268_vm0, %v73_v39 }
  0x7d   :  { %1317 = vmatprep.mubr.msk.f32.mxu0 %vm268_vm0, %v74_v40 }
  0x80   :  { %1318 = vmatmul.mubr.msk.f32.gmra.mrb[30].mxu0 %vm268_vm0, %v75_v41 }
  0x82   :  { %v1893_v43 = vpop.permute.xlu0 %190 }
  0x84   :  { %v111_v42 = vpop.permute.xlu1 %110 }
  0x86   :  { %v1898_v46 = vpop.permute.xlu0 %195 }
  0x88   :  { %v116_v45 = vpop.permute.xlu1 %115 }
  0x8a   :  { %v1902_v48 = vpop.permute.xlu0 %200 }
  0x8c   :  { %v1900_v47 = vpop.permute.xlu1 %205 }
  0x8e   :  { %v121_v50 = vpop.permute.xlu0 %120 }
  0x90   :  { %v126_v49 = vpop.permute.xlu1 %125 }
  0x92   :  { %v1906_v52 = vpop.permute.xlu0 %210 }
  0x94   :  { %v1904_v51 = vpop.permute.xlu1 %215 }
  0x96   :  { %v131_v54 = vpop.permute.xlu0 %130 }
  0x98   :  { %v136_v53 = vpop.permute.xlu1 %135 }
  0x9a   :  { %v1910_v56 = vpop.permute.xlu0 %220 }
  0x9c   :  { %v1908_v55 = vpop.permute.xlu1 %225 }
  0x9e   :  { %v141_v58 = vpop.permute.xlu0 %140 }
  0xa0   :  { %v146_v57 = vpop.permute.xlu1 %145 }
  0xa2   :  { %v1914_v60 = vpop.permute.xlu0 %230 }
  0xa4   :  { %v1912_v59 = vpop.permute.xlu1 %235 }
  0xa6   :  { %v151_v62 = vpop.permute.xlu0 %150 }
  0xa8   :  { %v156_v61 = vpop.permute.xlu1 %155 }
  0xaa   :  { %v1918_v0 = vpop.permute.xlu0 %240 }
  0xac   :  { %v1916_v63 = vpop.permute.xlu1 %245 }
  0xae   :  { %v161_v9 = vpop.permute.xlu0 %160 }
  0xb0   :  { %v166_v6 = vpop.permute.xlu1 %165 }
  0xb2   :  { %v1926_v22 = vpop.permute.xlu0 %250 }
  0xb4   :  { %v1922_v19 = vpop.permute.xlu1 %255 }
  0xb6   :  { %v171_v34 = vpop.permute.xlu0 %170 }
  0xb8   :  { %v176_v31 = vpop.permute.xlu1 %175 }
 0x117   :  { %v1274_v1 = vpop.f32.mrb[0].mxu0 }
 0x118   :  { %v485_v2 = vadd.f32 %v1274_v1, %v116_v45  ;;  %v479_v3 = vpop.f32.mrb[1].mxu0  ;;  %v1932_v45 = vpop.permute.xlu1 %265 }
 0x119   :  { %v480_v4 = vadd.f32 %v479_v3, %v111_v42 }
 0x11a   :  { %v639_v5 = vmax.f32 %v485_v2, 0.0 }
 0x11b   :  { %v638_v7 = vmax.f32 %v480_v4, 0.0  ;;  %v1277_v8 = vpop.f32.mrb[2].mxu0 }
 0x11c   :  { %v495_v10 = vadd.f32 %v1277_v8, %v126_v49  ;;  %v489_v11 = vpop.f32.mrb[3].mxu0  ;;  %v186_v4 = vpop.permute.xlu1 %185 }
 0x11d   :  { %v490_v12 = vadd.f32 %v489_v11, %v121_v50  ;;  %v1920_v13 = vpack.c.bf16 %v639_v5, %v638_v7 }
 0x11e   :  { %v641_v14 = vmax.f32 %v495_v10, 0.0 }
 0x11f   :  { %v640_v15 = vmax.f32 %v490_v12, 0.0  ;;  %v1280_v16 = vpop.f32.mrb[4].mxu0 }
 0x120   :  { %v505_v17 = vadd.f32 %v1280_v16, %v136_v53  ;;  %v499_v18 = vpop.f32.mrb[5].mxu0  ;;  %v1936_v53 = vpop.permute.xlu0 %260 }
 0x121   :  { %v1924_v20 = vpack.c.bf16 %v641_v14, %v640_v15  ;;  %v500_v21 = vadd.f32 %v499_v18, %v131_v54 }
 0x122   :  { %v643_v23 = vmax.f32 %v505_v17, 0.0 }
 0x123   :  { %v642_v24 = vmax.f32 %v500_v21, 0.0  ;;  %v1283_v25 = vpop.f32.mrb[6].mxu0 }
 0x124   :  { %v515_v26 = vadd.f32 %v1283_v25, %v146_v57  ;;  %v509_v27 = vpop.f32.mrb[7].mxu0  ;;  %v181_v7 = vpop.permute.xlu0 %180 }
 0x125   :  { %v1928_v28 = vpack.c.bf16 %v643_v23, %v642_v24  ;;  %v510_v29 = vadd.f32 %v509_v27, %v141_v58 }
 0x126   :  { %v645_v30 = vmax.f32 %v515_v26, 0.0 }
 0x127   :  { %v644_v32 = vmax.f32 %v510_v29, 0.0  ;;  %v1286_v33 = vpop.f32.mrb[8].mxu0 }
 0x128   :  { %v525_v35 = vadd.f32 %v1286_v33, %v156_v61  ;;  %v519_v36 = vpop.f32.mrb[9].mxu0 }
 0x129   :  { %v1930_v37 = vpack.c.bf16 %v645_v30, %v644_v32  ;;  %v520_v38 = vadd.f32 %v519_v36, %v151_v62 }
 0x12a   :  { %v647_v39 = vmax.f32 %v525_v35, 0.0 }
 0x12b   :  { %v646_v40 = vmax.f32 %v520_v38, 0.0  ;;  %v1289_v41 = vpop.f32.mrb[10].mxu0 }
 0x12c   :  { %v535_v42 = vadd.f32 %v1289_v41, %v166_v6  ;;  %v529_v44 = vpop.f32.mrb[11].mxu0 }
 0x12d   :  { %v1934_v49 = vpack.c.bf16 %v647_v39, %v646_v40  ;;  %v530_v50 = vadd.f32 %v529_v44, %v161_v9 }
 0x12e   :  { %v649_v54 = vmax.f32 %v535_v42, 0.0 }
 0x12f   :  { %v648_v57 = vmax.f32 %v530_v50, 0.0  ;;  %v1292_v58 = vpop.f32.mrb[12].mxu0 }
 0x130   :  { %v545_v61 = vadd.f32 %v1292_v58, %v176_v31  ;;  %v539_v1 = vpop.f32.mrb[13].mxu0 }
 0x131   :  { %v1938_v2 = vpack.c.bf16 %v649_v54, %v648_v57  ;;  %v540_v62 = vadd.f32 %v539_v1, %v171_v34 }
 0x132   :  { %v651_v3 = vmax.f32 %v545_v61, 0.0 }
 0x133   :  { %v650_v5 = vmax.f32 %v540_v62, 0.0  ;;  %v1295_v6 = vpop.f32.mrb[14].mxu0 }
 0x134   :  { %v555_v8 = vadd.f32 %v1295_v6, %v186_v4  ;;  %v549_v10 = vpop.f32.mrb[15].mxu0 }
 0x135   :  { %v1940_v11 = vpack.c.bf16 %v651_v3, %v650_v5  ;;  %v550_v9 = vadd.f32 %v549_v10, %v181_v7 }
 0x136   :  { %v653_v12 = vmax.f32 %v555_v8, 0.0 }
 0x137   :  { %v652_v14 = vmax.f32 %v550_v9, 0.0  ;;  %v1298_v15 = vpop.f32.mrb[16].mxu0 }
 0x138   :  { %v565_v16 = vadd.f32 %v1298_v15, %v1898_v46  ;;  %v559_v17 = vpop.f32.mrb[17].mxu0  ;;  %v679_v15 = vld [vmem:[%s2090_s3 + $0x48] sm:$0xff] }
 0x139   :  { %v1943_v18 = vpack.c.bf16 %v653_v12, %v652_v14  ;;  %v560_v21 = vadd.f32 %v559_v17, %v1893_v43  ;;  %v677_v12 = vld [vmem:[%s2090_s3 + $0x38] sm:$0xff]  ;;  %v676_v14 = vld [vmem:[%s2090_s3 + $0x30] sm:$0xff] }
 0x13a   :  { %v655_v23 = vmax.f32 %v565_v16, 0.0  ;;  %v678_v16 = vld [vmem:[%s2090_s3 + $0x40] sm:$0xff]  ;;  %v681_v17 = vld [vmem:[%s2090_s3 + $0x58] sm:$0xff] }
 0x13b   :  { %v654_v24 = vmax.f32 %v560_v21, 0.0  ;;  %v1301_v25 = vpop.f32.mrb[18].mxu0  ;;  %v683_v21 = vld [vmem:[%s2090_s3 + $0x68] sm:$0xff] }
 0x13c   :  { %v575_v26 = vadd.f32 %v1301_v25, %v1900_v47  ;;  %v569_v27 = vpop.f32.mrb[19].mxu0  ;;  %v684_v25 = vld [vmem:[%s2090_s3 + $0x70] sm:$0xff] }
 0x13d   :  { %v570_v29 = vadd.f32 %v569_v27, %v1902_v48  ;;  %v1403_v30 = vpack.c.bf16 %v655_v23, %v654_v24  ;;  %v682_v23 = vld [vmem:[%s2090_s3 + $0x60] sm:$0xff]  ;;  %v685_v24 = vld [vmem:[%s2090_s3 + $0x78] sm:$0xff] }
 0x13e   :  { %v657_v31 = vmax.f32 %v575_v26, 0.0  ;;  %v687_v26 = vld [vmem:[%s2090_s3 + $0x88] sm:$0xff]  ;;  %v686_v27 = vld [vmem:[%s2090_s3 + $0x80] sm:$0xff] }
 0x13f   :  { %v656_v32 = vmax.f32 %v570_v29, 0.0  ;;  %v1304_v33 = vpop.f32.mrb[20].mxu0  ;;  %1404 = vmatprep.subr.bf16.mxu1 %v1403_v30  ;;  %v689_v29 = vld [vmem:[%s2090_s3 + $0x98] sm:$0xff]  ;;  %v688_v30 = vld [vmem:[%s2090_s3 + $0x90] sm:$0xff] }
 0x140   :  { %v585_v46 = vadd.f32 %v1304_v33, %v1904_v51  ;;  %v579_v34 = vpop.f32.mrb[21].mxu0  ;;  %1406 = vmatpush3.bf16.msra.mxu1 %v1920_v13  ;;  %v693_v33 = vld [vmem:[%s2090_s3 + $0xb8] sm:$0xff] }
 0x141   :  { %v1407_v35 = vpack.c.bf16 %v657_v31, %v656_v32  ;;  %v580_v43 = vadd.f32 %v579_v34, %v1906_v52  ;;  %v691_v31 = vld [vmem:[%s2090_s3 + $0xa8] sm:$0xff]  ;;  %v690_v32 = vld [vmem:[%s2090_s3 + $0xa0] sm:$0xff] }
 0x142   :  { %v659_v36 = vmax.f32 %v585_v46, 0.0  ;;  %v692_v46 = vld [vmem:[%s2090_s3 + $0xb0] sm:$0xff]  ;;  %v695_v34 = vld [vmem:[%s2090_s3 + $0xc8] sm:$0xff] }
 0x143   :  { %v658_v38 = vmax.f32 %v580_v43, 0.0  ;;  %v1307_v39 = vpop.f32.mrb[22].mxu0  ;;  %1408 = vmatprep.subr.bf16.mxu1 %v1407_v35  ;;  %v694_v35 = vld [vmem:[%s2090_s3 + $0xc0] sm:$0xff]  ;;  %v697_v43 = vld [vmem:[%s2090_s3 + $0xd8] sm:$0xff] }
 0x144   :  { %v595_v47 = vadd.f32 %v1307_v39, %v1908_v55  ;;  %v589_v48 = vpop.f32.mrb[23].mxu0  ;;  %1410 = vmatpush3.bf16.msra.mxu1 %v1924_v20  ;;  %v698_v39 = vld [vmem:[%s2090_s3 + $0xe0] sm:$0xff] }
 0x145   :  { %v1411_v40 = vpack.c.bf16 %v659_v36, %v658_v38  ;;  %v590_v41 = vadd.f32 %v589_v48, %v1910_v56  ;;  %v696_v36 = vld [vmem:[%s2090_s3 + $0xd0] sm:$0xff]  ;;  %v699_v38 = vld [vmem:[%s2090_s3 + $0xe8] sm:$0xff] }
 0x146   :  { %v661_v42 = vmax.f32 %v595_v47, 0.0  ;;  %v701_v47 = vld [vmem:[%s2090_s3 + $0xf8] sm:$0xff]  ;;  %v700_v48 = vld [vmem:[%s2090_s3 + $0xf0] sm:$0xff] }
 0x147   :  { %v660_v51 = vmax.f32 %v590_v41, 0.0  ;;  %v1310_v44 = vpop.f32.mrb[24].mxu0  ;;  %1412 = vmatprep.subr.bf16.mxu1 %v1411_v40  ;;  %v1491_v40 = vmov 0.0|0.0   ;;  %v1493_v41 = vmov 0.0  }
 0x148   :  { %v605_v13 = vadd.f32 %v1310_v44, %v1912_v59  ;;  %v599_v50 = vpop.f32.mrb[25].mxu0  ;;  %1414 = vmatpush3.bf16.msra.mxu1 %v1928_v28 }
 0x149   :  { %v1415_v52 = vpack.c.bf16 %v661_v42, %v660_v51  ;;  %v600_v54 = vadd.f32 %v599_v50, %v1914_v60  ;;  %v721_v50 = vpop.permute.xlu0 %720 }
 0x14a   :  { %v663_v57 = vmax.f32 %v605_v13, 0.0 }
 0x14b   :  { %v662_v55 = vmax.f32 %v600_v54, 0.0  ;;  %v1313_v58 = vpop.f32.mrb[26].mxu0  ;;  %1416 = vmatprep.subr.bf16.mxu1 %v1415_v52 }
 0x14c   :  { %v615_v20 = vadd.f32 %v1313_v58, %v1916_v63  ;;  %v609_v61 = vpop.f32.mrb[27].mxu0  ;;  %1418 = vmatpush3.bf16.msra.mxu1 %v1930_v37 }
 0x14d   :  { %v1419_v56 = vpack.c.bf16 %v663_v57, %v662_v55  ;;  %v610_v1 = vadd.f32 %v609_v61, %v1918_v0  ;;  %v726_v55 = vpop.permute.xlu1 %725 }
 0x14e   :  { %v665_v62 = vmax.f32 %v615_v20, 0.0 }
 0x14f   :  { %v664_v59 = vmax.f32 %v610_v1, 0.0  ;;  %v1316_v3 = vpop.f32.mrb[28].mxu0  ;;  %1420 = vmatprep.subr.bf16.mxu1 %v1419_v56 }
 0x150   :  { %v625_v28 = vadd.f32 %v1316_v3, %v1922_v19  ;;  %v619_v4 = vpop.f32.mrb[29].mxu0  ;;  %1422 = vmatpush3.bf16.msra.mxu1 %v1934_v49 }
 0x151   :  { %v1423_v60 = vpack.c.bf16 %v665_v62, %v664_v59  ;;  %v620_v5 = vadd.f32 %v619_v4, %v1926_v22  ;;  %v670_v22 = vld [vmem:[%s2090_s3] sm:$0xff] }
 0x152   :  { %v667_v6 = vmax.f32 %v625_v28, 0.0  ;;  %v731_v28 = vpop.permute.xlu0 %730 }
 0x153   :  { %v666_v63 = vmax.f32 %v620_v5, 0.0  ;;  %v1319_v7 = vpop.f32.mrb[30].mxu0  ;;  %1424 = vmatprep.subr.bf16.mxu1 %v1423_v60 }
 0x154   :  { %v635_v37 = vadd.f32 %v1319_v7, %v1932_v45  ;;  %v629_v8 = vpop.f32.mrb[31].mxu0  ;;  %1426 = vmatpush3.bf16.msra.mxu1 %v1938_v2  ;;  %v673_v45 = vld [vmem:[%s2090_s3 + $0x18] sm:$0xff]  ;;  %v675_v2 = vld [vmem:[%s2090_s3 + $0x28] sm:$0xff] }
 0x155   :  { %v1427_v0 = vpack.c.bf16 %v667_v6, %v666_v63  ;;  %v630_v10 = vadd.f32 %v629_v8, %v1936_v53  ;;  %v672_v53 = vld [vmem:[%s2090_s3 + $0x10] sm:$0xff]  ;;  %v736_v6 = vpop.permute.xlu1 %735 }
 0x156   :  { %v669_v9 = vmax.f32 %v635_v37, 0.0 }
 0x157   :  { %v668_v19 = vmax.f32 %v630_v10, 0.0  ;;  %1428 = vmatprep.subr.bf16.mxu1 %v1427_v0 }
 0x158   :  { %1430 = vmatpush3.bf16.msra.mxu1 %v1940_v11  ;;  %v674_v11 = vld [vmem:[%s2090_s3 + $0x20] sm:$0xff] }
 0x159   :  { %v1431_v49 = vpack.c.bf16 %v669_v9, %v668_v19 }
 0x15b   :  { %1432 = vmatprep.subr.bf16.mxu1 %v1431_v49  ;;  %v741_v49 = vpop.permute.xlu0 %740 }
 0x15c   :  { %1434 = vmatpush3.bf16.msra.mxu1 %v1943_v18  ;;  %v680_v18 = vld [vmem:[%s2090_s3 + $0x50] sm:$0xff] }
 0x15d   :  { %1435 = vmatprep.subr.bf16.mxu1 %v1491_v40 }
 0x15f   :  { %863 = vmatmul.mubr.f32.vlgmr.msra.gmra.mrb[0].mxu1 %v670_v22 }
 0x160   :  { %867 = vmatprep.mubr.f32.mxu1 %v673_v45 }
 0x163   :  { %868 = vmatmul.mubr.f32.gmra.mrb[2].mxu1 %v672_v53 }
 0x164   :  { %872 = vmatprep.mubr.f32.mxu1 %v675_v2  ;;  %v746_v2 = vpop.permute.xlu1 %745 }
 0x167   :  { %873 = vmatmul.mubr.f32.gmra.mrb[4].mxu1 %v674_v11 }
 0x168   :  { %877 = vmatprep.mubr.f32.mxu1 %v677_v12 }
 0x16b   :  { %878 = vmatmul.mubr.f32.gmra.mrb[6].mxu1 %v676_v14 }
 0x16c   :  { %882 = vmatprep.mubr.f32.mxu1 %v679_v15 }
 0x16f   :  { %883 = vmatmul.mubr.f32.gmra.mrb[8].mxu1 %v678_v16 }
 0x170   :  { %887 = vmatprep.mubr.f32.mxu1 %v681_v17 }
 0x173   :  { %888 = vmatmul.mubr.f32.gmra.mrb[10].mxu1 %v680_v18 }
 0x174   :  { %892 = vmatprep.mubr.f32.mxu1 %v683_v21 }
 0x177   :  { %893 = vmatmul.mubr.f32.gmra.mrb[12].mxu1 %v682_v23  ;;  %v751_v23 = vpop.permute.xlu0 %750 }
 0x178   :  { %897 = vmatprep.mubr.f32.mxu1 %v685_v24 }
 0x17b   :  { %898 = vmatmul.mubr.f32.gmra.mrb[14].mxu1 %v684_v25 }
 0x17c   :  { %902 = vmatprep.mubr.f32.mxu1 %v687_v26 }
 0x17f   :  { %903 = vmatmul.mubr.f32.gmra.mrb[16].mxu1 %v686_v27  ;;  %v756_v27 = vpop.permute.xlu1 %755 }
 0x180   :  { %907 = vmatprep.mubr.f32.mxu1 %v689_v29 }
 0x183   :  { %908 = vmatmul.mubr.f32.gmra.mrb[18].mxu1 %v688_v30 }
 0x184   :  { %912 = vmatprep.mubr.f32.mxu1 %v691_v31 }
 0x187   :  { %913 = vmatmul.mubr.f32.gmra.mrb[20].mxu1 %v690_v32 }
 0x188   :  { %917 = vmatprep.mubr.f32.mxu1 %v693_v33 }
 0x18b   :  { %918 = vmatmul.mubr.f32.gmra.mrb[22].mxu1 %v692_v46 }
 0x18c   :  { %922 = vmatprep.mubr.f32.mxu1 %v695_v34 }
 0x18f   :  { %923 = vmatmul.mubr.f32.gmra.mrb[24].mxu1 %v694_v35 }
 0x190   :  { %927 = vmatprep.mubr.f32.mxu1 %v697_v43  ;;  %v761_v43 = vpop.permute.xlu0 %760 }
 0x193   :  { %928 = vmatmul.mubr.f32.gmra.mrb[26].mxu1 %v696_v36 }
 0x194   :  { %932 = vmatprep.mubr.f32.mxu1 %v699_v38 }
 0x197   :  { %933 = vmatmul.mubr.f32.gmra.mrb[28].mxu1 %v698_v39 }
 0x198   :  { %937 = vmatprep.mubr.f32.mxu1 %v701_v47  ;;  %v766_v47 = vpop.permute.xlu1 %765 }
 0x19b   :  { %938 = vmatmul.mubr.f32.gmra.mrb[30].mxu1 %v700_v48 }
 0x19c   :  { %1352 = vmatprep.mubr.msk.f32.mxu1 %vm1492_vm2, %v1493_v41 }
 0x232   :  { %v1175_v42 = vpop.f32.mrb[0].mxu1 }
 0x233   :  { %v1176_v51 = vpop.f32.mrb[1].mxu1 }
 0x234   :  { %v1177_v44 = vadd.f32 %v1176_v51, %v1175_v42 }
 0x236   :  { %v1178_v13 = vpop.f32.mrb[2].mxu1  ;;  %v865_v54 = vadd.f32 %v1177_v44, %v721_v50 }
 0x237   :  { %v1179_v52 = vpop.f32.mrb[3].mxu1 }
 0x238   :  { %v1180_v57 = vadd.f32 %v1179_v52, %v1178_v13  ;;  %v943_v56 = vmax.f32 %v865_v54, 0.0  ;;  %v771_v54 = vpop.permute.xlu0 %770 }
 0x23a   :  { %v870_v58 = vadd.f32 %v1180_v57, %v726_v55  ;;  %v1181_v20 = vpop.f32.mrb[4].mxu1 }
 0x23b   :  { %v1182_v61 = vpop.f32.mrb[5].mxu1 }
 0x23c   :  { %v944_v1 = vmax.f32 %v870_v58, 0.0  ;;  %v1183_v62 = vadd.f32 %v1182_v61, %v1181_v20  ;;  %v776_v20 = vpop.permute.xlu1 %775 }
 0x23e   :  { %v1436_v59 = vpack.c.bf16 %v944_v1, %v943_v56  ;;  %v1184_v3 = vpop.f32.mrb[6].mxu1  ;;  %v875_v60 = vadd.f32 %v1183_v62, %v731_v28 }
 0x23f   :  { %v1185_v4 = vpop.f32.mrb[7].mxu1 }
 0x240   :  { %v1186_v5 = vadd.f32 %v1185_v4, %v1184_v3  ;;  %1437 = vmatpush3.bf16.msra.mxu1 %v1436_v59  ;;  %v945_v8 = vmax.f32 %v875_v60, 0.0  ;;  %v781_v60 = vpop.permute.xlu0 %780 }
 0x241   :  { %1438 = vmatprep.subr.bf16.mxu1 %v1491_v40 }
 0x242   :  { %v880_v63 = vadd.f32 %v1186_v5, %v736_v6  ;;  %v1187_v7 = vpop.f32.mrb[8].mxu1 }
 0x243   :  { %v1188_v37 = vpop.f32.mrb[9].mxu1 }
 0x244   :  { %v946_v0 = vmax.f32 %v880_v63, 0.0  ;;  %v1189_v10 = vadd.f32 %v1188_v37, %v1187_v7  ;;  %v786_v7 = vpop.permute.xlu1 %785 }
 0x246   :  { %v1439_v9 = vpack.c.bf16 %v946_v0, %v945_v8  ;;  %v1190_v19 = vpop.f32.mrb[10].mxu1  ;;  %v885_v45 = vadd.f32 %v1189_v10, %v741_v49 }
 0x247   :  { %v1191_v22 = vpop.f32.mrb[11].mxu1 }
 0x248   :  { %v1192_v53 = vadd.f32 %v1191_v22, %v1190_v19  ;;  %1440 = vmatpush3.bf16.msra.mxu1 %v1439_v9  ;;  %v947_v15 = vmax.f32 %v885_v45, 0.0  ;;  %v791_v45 = vpop.permute.xlu0 %790 }
 0x249   :  { %1441 = vmatprep.subr.bf16.mxu1 %v1491_v40 }
 0x24a   :  { %v890_v11 = vadd.f32 %v1192_v53, %v746_v2  ;;  %v1193_v12 = vpop.f32.mrb[12].mxu1 }
 0x24b   :  { %v1194_v14 = vpop.f32.mrb[13].mxu1 }
 0x24c   :  { %v948_v16 = vmax.f32 %v890_v11, 0.0  ;;  %v1195_v17 = vadd.f32 %v1194_v14, %v1193_v12  ;;  %v796_v12 = vpop.permute.xlu1 %795 }
 0x24e   :  { %v1442_v18 = vpack.c.bf16 %v948_v16, %v947_v15  ;;  %v1196_v21 = vpop.f32.mrb[14].mxu1  ;;  %v895_v25 = vadd.f32 %v1195_v17, %v751_v23 }
 0x24f   :  { %v1197_v24 = vpop.f32.mrb[15].mxu1 }
 0x250   :  { %v1198_v26 = vadd.f32 %v1197_v24, %v1196_v21  ;;  %1443 = vmatpush3.bf16.msra.mxu1 %v1442_v18  ;;  %v949_v32 = vmax.f32 %v895_v25, 0.0  ;;  %v959_v18 = vld [vmem:[%s2092_s5] sm:$0x1]  ;;  %v961_v21 = vstv %s2093_s6 }
 0x251   :  { %1444 = vmatprep.subr.bf16.mxu1 %v1491_v40 }
 0x252   :  { %v900_v29 = vadd.f32 %v1198_v26, %v756_v27  ;;  %v1199_v30 = vpop.f32.mrb[16].mxu1 }
 0x253   :  { %v1200_v31 = vpop.f32.mrb[17].mxu1 }
 0x254   :  { %v950_v33 = vmax.f32 %v900_v29, 0.0  ;;  %v1201_v46 = vadd.f32 %v1200_v31, %v1199_v30 }
 0x256   :  { %v1445_v34 = vpack.c.bf16 %v950_v33, %v949_v32  ;;  %v1202_v35 = vpop.f32.mrb[18].mxu1  ;;  %v905_v38 = vadd.f32 %v1201_v46, %v761_v43 }
 0x257   :  { %v1203_v36 = vpop.f32.mrb[19].mxu1 }
 0x258   :  { %v1204_v39 = vadd.f32 %v1203_v36, %v1202_v35  ;;  %1446 = vmatpush3.bf16.msra.mxu1 %v1445_v34  ;;  %v951_v51 = vmax.f32 %v905_v38, 0.0 }
 0x259   :  { %1447 = vmatprep.subr.bf16.mxu1 %v1491_v40 }
 0x25a   :  { %v910_v48 = vadd.f32 %v1204_v39, %v766_v47  ;;  %v1205_v41 = vpop.f32.mrb[20].mxu1 }
 0x25b   :  { %v1206_v42 = vpop.f32.mrb[21].mxu1 }
 0x25c   :  { %v952_v44 = vmax.f32 %v910_v48, 0.0  ;;  %v1207_v13 = vadd.f32 %v1206_v42, %v1205_v41 }
 0x25e   :  { %v1448_v50 = vpack.c.bf16 %v952_v44, %v951_v51  ;;  %v1208_v52 = vpop.f32.mrb[22].mxu1  ;;  %v915_v55 = vadd.f32 %v1207_v13, %v771_v54 }
 0x25f   :  { %v1209_v57 = vpop.f32.mrb[23].mxu1 }
 0x260   :  { %v1210_v58 = vadd.f32 %v1209_v57, %v1208_v52  ;;  %1449 = vmatpush3.bf16.msra.mxu1 %v1448_v50  ;;  %v953_v62 = vmax.f32 %v915_v55, 0.0 }
 0x261   :  { %1450 = vmatprep.subr.bf16.mxu1 %v1491_v40 }
 0x262   :  { %v920_v61 = vadd.f32 %v1210_v58, %v776_v20  ;;  %v1211_v56 = vpop.f32.mrb[24].mxu1 }
 0x263   :  { %v1212_v1 = vpop.f32.mrb[25].mxu1 }
 0x264   :  { %v954_v59 = vmax.f32 %v920_v61, 0.0  ;;  %v1213_v3 = vadd.f32 %v1212_v1, %v1211_v56 }
 0x266   :  { %v1451_v28 = vpack.c.bf16 %v954_v59, %v953_v62  ;;  %v1214_v4 = vpop.f32.mrb[26].mxu1  ;;  %v925_v6 = vadd.f32 %v1213_v3, %v781_v60 }
 0x267   :  { %v1215_v5 = vpop.f32.mrb[27].mxu1 }
 0x268   :  { %v1216_v63 = vadd.f32 %v1215_v5, %v1214_v4  ;;  %1452 = vmatpush3.bf16.msra.mxu1 %v1451_v28  ;;  %v955_v10 = vmax.f32 %v925_v6, 0.0 }
 0x269   :  { %1453 = vmatprep.subr.bf16.mxu1 %v1491_v40 }
 0x26a   :  { %v930_v37 = vadd.f32 %v1216_v63, %v786_v7  ;;  %v1217_v8 = vpop.f32.mrb[28].mxu1 }
 0x26b   :  { %v1218_v0 = vpop.f32.mrb[29].mxu1 }
 0x26c   :  { %v956_v9 = vmax.f32 %v930_v37, 0.0  ;;  %v1219_v19 = vadd.f32 %v1218_v0, %v1217_v8 }
 0x26e   :  { %v1454_v49 = vpack.c.bf16 %v956_v9, %v955_v10  ;;  %v1220_v22 = vpop.f32.mrb[30].mxu1  ;;  %v935_v2 = vadd.f32 %v1219_v19, %v791_v45 }
 0x26f   :  { %v1221_v53 = vpop.f32.mrb[31].mxu1 }
 0x270   :  { %v1222_v11 = vadd.f32 %v1221_v53, %v1220_v22  ;;  %1455 = vmatpush3.bf16.msra.mxu1 %v1454_v49  ;;  %v957_v15 = vmax.f32 %v935_v2, 0.0 }
 0x271   :  { %1456 = vmatprep.subr.bf16.mxu1 %v1491_v40 }
 0x272   :  { %v940_v14 = vadd.f32 %v1222_v11, %v796_v12 }
 0x274   :  { %v958_v16 = vmax.f32 %v940_v14, 0.0 }
 0x276   :  { %v1457_v17 = vpack.c.bf16 %v958_v16, %v957_v15 }
 0x278   :  { %1458 = vmatpush3.bf16.msra.mxu1 %v1457_v17 }
 0x27b   :  { %1353 = vmatmul.mubr.f32.vlgmr.msra.gmra.mrb[32].mxu1 %v959_v18 }
 0x34e   :  { %v1028_v23 = vpop.f32.mrb[32].mxu1 }
 0x34f   :  { %v1029_v24 = vadd.f32 %v1028_v23, %v961_v21  ;;  %v1354_v25 = vpop.f32.mrb[33].mxu1 }
 0x351   :  { %1032 = vst [vmem:[#allocation3] sm:$0x1] %v1029_v24 }
 0x352   :  { %1477 = shalt.err (!%p1474_p4)
}
 0x353   :  { %s1478_s2 = scalar_lea.hbm %s2094_s7, 16 }
 0x354   :  { %p1479_p5 = scmp.ne.s32.totalorder %s2094_s7, %s1478_s2  ;;  %p1482_p6 = scmp.lt.u32.totalorder %s1478_s2, %s2094_s7 }
 0x356   :  { %p1484_p7 = pnand %p1482_p6, %p1479_p5 }
 0x358   :  { %1487 = shalt.err (!%p1484_p7)
}
 0x359   :  { %1042 = dma.vmem_to_hbm [thread:$0]  %s1040_s11, 16, %s2094_s7, [#allocation4]  }
 0x35a   :  { %1488 = dma.done.wait [#allocation4], 16  }
 0x35b   :  { %1489 = vsyncadd [#allocation4], 4294967280 }
 0x35c   :  { %1046 = vsyncpa [#allocation4], 1 }

</bundles_post_ra>
